<compile_context>
chip_gen: v7x
topology: tpu7x:2x2x1
jax: 0.10.0
libtpu: 0.0.40
codegen_flags: <defaults>
</compile_context>

<pallas_src>
import functools

import jax
import jax.numpy as jnp
from jax.experimental import pallas as pl
from jax.experimental.pallas import tpu as pltpu


def _shifted_diff(t, axis, use_roll):
    """t[i] - t[i+1] along `axis` of a (C, TH, W) value."""
    size = t.shape[axis]
    if use_roll:
        # roll(t, size-1)[i] == t[(i+1) % size]; the wrapped entry is masked
        # out of the weights later.
        return t - pltpu.roll(t, shift=size - 1, axis=axis)
    lo = [slice(None)] * t.ndim
    hi = [slice(None)] * t.ndim
    lo[axis] = slice(None, -1)
    hi[axis] = slice(1, None)
    return t[tuple(lo)] - t[tuple(hi)]


def _edge_weights(i_grad, sem_seg):
    """exp(-mean_c f(image_grad)); channel axis reduced away."""
    if sem_seg == 1:
        i_mag = (i_grad > 0).astype(jnp.float32) * 10.0     # already >= 0: skip abs
    elif sem_seg == 2:
        i_mag = (i_grad == 0).astype(jnp.float32) * 100.0   # already >= 0: skip abs
    else:
        i_mag = jnp.abs(i_grad).astype(jnp.float32)
    return jnp.exp(-jnp.mean(i_mag, axis=0))                # EUP exp


def _weighted_abs_sum(d_grad, weights):
    """sum(|d_grad| * weights); channel reduce before the (single) multiply."""
    d_abs = jnp.sum(jnp.abs(d_grad).astype(jnp.float32), axis=0)   # (TH', W')
    # Hierarchical reduce: sublane-axis sums first, then one cross-lane reduce.
    return jnp.sum(jnp.sum(d_abs * weights, axis=0))


def _directional_sum(depth, image, axis, *, sem_seg, use_roll):
    size = depth.shape[axis]
    d_grad = _shifted_diff(depth, axis, use_roll)
    i_grad = _shifted_diff(image, axis, use_roll)
    weights = _edge_weights(i_grad, sem_seg)                # (TH', W')
    if use_roll:
        # Mask the wrapped row/column out of the small weights array instead of
        # the (Cd, TH, W) product.  |d*w| == |d|*w (w >= 0); the sem_seg==2
        # negation of the reference is a no-op under the abs and is dropped.
        idx = jax.lax.broadcasted_iota(jnp.int32, weights.shape, axis - 1)
        weights = jnp.where(idx < size - 1, weights, 0.0)
    return _weighted_abs_sum(d_grad, weights)


def _smooth_loss_kernel(depth_ref, image_ref, out_ref, carry_d_ref, carry_i_ref,
                        *, sem_seg, roll_h, roll_w, tile_h):
    h = pl.program_id(1)

    depth = depth_ref[0]   # (Cd, TH, W), input dtype (bf16 ok)
    image = image_ref[0]   # (Ci, TH, W)

    @pl.when(h == 0)
    def _():
        out_ref[0, 0, 0] = jnp.float32(0.0)
        out_ref[0, 0, 1] = jnp.float32(0.0)

    # Boundary H-gradient row between the previous tile's carried last row and
    # the first row of this tile.
    @pl.when(h > 0)
    def _():
        bd_grad = carry_d_ref[...] - depth[:, 0:1, :]       # (Cd, 1, W)
        bi_grad = carry_i_ref[...] - image[:, 0:1, :]       # (Ci, 1, W)
        w = _edge_weights(bi_grad, sem_seg)                 # (1, W)
        out_ref[0, 0, 0] += _weighted_abs_sum(bd_grad, w)

    # Save this tile's last row for the next H-tile's boundary gradient.
    carry_d_ref[...] = depth[:, tile_h - 1:tile_h, :]
    carry_i_ref[...] = image[:, tile_h - 1:tile_h, :]

    # x (H-direction) path fully computed and reduced before the y path starts,
    # so only one set of full-size gradient temporaries is live at a time.
    out_ref[0, 0, 0] += _directional_sum(depth, image, 1,
                                         sem_seg=sem_seg, use_roll=roll_h)
    out_ref[0, 0, 1] += _directional_sum(depth, image, 2,
                                         sem_seg=sem_seg, use_roll=roll_w)


def _per_tile_bytes(th, W, Cd, Ci, itemsize):
    # Double-buffered input blocks + in-dtype gradient temporaries + f32
    # magnitude/weight temporaries (conservative).
    return (Cd + Ci) * th * W * (4 * itemsize + 4 * 4)


def _pick_tile_h(N, H, W, Cd, Ci, itemsize, budget):
    # Legal TH values: divide H and be a multiple of 8 (sublane tile), or H.
    # TODO(synk): TH values that do not divide H (partial last tile with masked
    # rows) are not supported; prime H falls back to a single full-H tile.
    cands = [d for d in range(8, H, 8) if H % d == 0] + [H]
    fitting = [d for d in cands if _per_tile_bytes(d, W, Cd, Ci, itemsize) <= budget]
    pool = fitting if fitting else [min(cands)]
    th = max(pool)
    # Trade tile size for pipeline depth when the total grid would be tiny.
    if N * (H // th) < 4:
        deeper = [d for d in pool if N * (H // d) >= 4]
        if deeper:
            th = max(deeper)
    return th


def smooth_loss(depth, image, sem_seg: int = 0, *, tile_h=None, buffer_count=None):
    """Pallas implementation of SmoothLoss.forward(depth, image, sem_seg)."""
    N, Cd, H, W = depth.shape
    Ni, Ci, Hi, Wi = image.shape
    assert (N, H, W) == (Ni, Hi, Wi), "depth/image batch+spatial dims must match"

    itemsize = max(jnp.dtype(depth.dtype).itemsize, jnp.dtype(image.dtype).itemsize)

    # Physical VMEM of this generation (64 MiB on v7x, 128 MiB on v5e/v6e);
    # leave headroom for the runtime, pipeline buffers and Mosaic scratch.
    try:
        vmem_phys = int(pltpu.get_tpu_info().vmem_capacity_bytes)
    except Exception:
        vmem_phys = 64 << 20                               # assume worst case (v7x)
    vmem_cap = vmem_phys - (8 << 20)

    if tile_h is None:
        tile_h = _pick_tile_h(N, H, W, Cd, Ci, itemsize,
                              budget=min(vmem_cap - (8 << 20), 96 << 20))
    assert H % tile_h == 0, "tile_h must divide H"
    num_h_tiles = H // tile_h

    # Per-axis shift strategy.  Lane roll only needs W alignment; sublane roll
    # is kept conservative (full vreg-aligned tile).  The sublane-slice
    # fallback is cheap; the lane-slice fallback is the expensive one.
    roll_w = (W % 128 == 0)
    roll_h = (tile_h % 8 == 0) and (W % 128 == 0)
    # TODO(synk): pad W to a multiple of 128 (masked) so unaligned widths such
    # as 832/1242 can use the lane roll instead of a (W-1) lane slice.

    kernel = functools.partial(_smooth_loss_kernel, sem_seg=sem_seg,
                               roll_h=roll_h, roll_w=roll_w, tile_h=tile_h)

    per_tile = _per_tile_bytes(tile_h, W, Cd, Ci, itemsize)
    vmem_limit = int(min(max(per_tile + (8 << 20), 32 << 20), vmem_cap))

    cost = pl.CostEstimate(
        flops=int(10 * N * (Cd + Ci) * H * W),
        transcendentals=int(2 * N * H * W),
        bytes_accessed=int(depth.size * jnp.dtype(depth.dtype).itemsize
                           + image.size * jnp.dtype(image.dtype).itemsize
                           + 8 * N),
    )

    def in_spec(C):
        kwargs = {}
        if buffer_count is not None:   # optional deeper pipelining knob
            kwargs["pipeline_mode"] = pl.Buffered(buffer_count)
        return pl.BlockSpec((1, C, tile_h, W), lambda n, h: (n, 0, h, 0), **kwargs)

    sums = pl.pallas_call(
        kernel,
        out_shape=jax.ShapeDtypeStruct((N, 1, 2), jnp.float32),
        grid=(N, num_h_tiles),
        in_specs=[in_spec(Cd), in_spec(Ci)],
        out_specs=pl.BlockSpec((1, 1, 2), lambda n, h: (n, 0, 0),
                               memory_space=pltpu.SMEM),
        scratch_shapes=[
            pltpu.VMEM((Cd, 1, W), depth.dtype),   # carried last depth row
            pltpu.VMEM((Ci, 1, W), image.dtype),   # carried last image row
        ],
        compiler_params=pltpu.CompilerParams(
            # TODO(synk): on v7x verify the batch axis actually shards across
            # both TensorCores; if xprof shows one core busy, switch this axis
            # to pltpu.CORE_PARALLEL.
            dimension_semantics=("parallel", "arbitrary"),
            vmem_limit_bytes=vmem_limit,
        ),
        cost_estimate=cost,
    )(depth, image)

    # Tiny final cross-batch reduction + normalization in plain JAX.
    count_x = N * Cd * (H - 1) * W
    count_y = N * Cd * H * (W - 1)
    return jnp.sum(sums[:, 0, 0]) / count_x + jnp.sum(sums[:, 0, 1]) / count_y


def smooth_loss_ref(depth, image, sem_seg: int = 0):
    """Pure-JAX reference (mirrors the PyTorch module) for validation."""
    depth = depth.astype(jnp.float32)
    image = image.astype(jnp.float32)
    dgx = depth[:, :, :-1, :] - depth[:, :, 1:, :]
    dgy = depth[:, :, :, :-1] - depth[:, :, :, 1:]
    igx = image[:, :, :-1, :] - image[:, :, 1:, :]
    igy = image[:, :, :, :-1] - image[:, :, :, 1:]
    if sem_seg == 1:
        igx = (igx > 0).astype(jnp.float32) * 10.0
        igy = (igy > 0).astype(jnp.float32) * 10.0
    if sem_seg == 2:
        igx = (igx == 0).astype(jnp.float32) * 100.0
        igy = (igy == 0).astype(jnp.float32) * 100.0
    wx = jnp.exp(-jnp.mean(jnp.abs(igx), axis=1, keepdims=True))
    wy = jnp.exp(-jnp.mean(jnp.abs(igy), axis=1, keepdims=True))
    sx = dgx * wx
    sy = dgy * wy
    if sem_seg == 2:
        sx, sy = -sx, -sy
    return jnp.mean(jnp.abs(sx)) + jnp.mean(jnp.abs(sy))


if __name__ == "__main__":
    key = jax.random.PRNGKey(0)
    k_depth, k_image = jax.random.split(key)

    # 1) Unaligned small shape (slice path), 2 H-tiles -> exercises halo carry.
    N, H, W = 2, 16, 16
    depth = jax.random.uniform(k_depth, (N, 1, H, W), dtype=jnp.float32)
    image = jax.random.uniform(k_image, (N, 3, H, W), dtype=jnp.float32)
    for sem_seg in (0, 1, 2):
        loss = smooth_loss(depth, image, sem_seg=sem_seg, tile_h=8)
        jax.block_until_ready(loss)
        ref = smooth_loss_ref(depth, image, sem_seg=sem_seg)
        assert jnp.allclose(loss, ref, rtol=2e-5, atol=1e-6), (sem_seg, loss, ref)

    # 2) vreg-aligned shape (roll path), 2 H-tiles -> halo carry + XLU rolls.
    H2, W2 = 16, 128
    depth2 = jax.random.uniform(k_depth, (1, 1, H2, W2), dtype=jnp.float32)
    image2 = jax.random.uniform(k_image, (1, 3, H2, W2), dtype=jnp.float32)
    for sem_seg in (0, 1, 2):
        loss = smooth_loss(depth2, image2, sem_seg=sem_seg, tile_h=8)
        jax.block_until_ready(loss)
        ref = smooth_loss_ref(depth2, image2, sem_seg=sem_seg)
        assert jnp.allclose(loss, ref, rtol=2e-5, atol=1e-6), (sem_seg, loss, ref)

    # 3) bf16 inputs (halved HBM traffic); accumulation stays in f32.
    loss_bf16 = smooth_loss(depth2.astype(jnp.bfloat16),
                            image2.astype(jnp.bfloat16), sem_seg=0, tile_h=8)
    jax.block_until_ready(loss_bf16)
    ref_bf16 = smooth_loss_ref(depth2.astype(jnp.bfloat16),
                               image2.astype(jnp.bfloat16), sem_seg=0)
    assert jnp.isfinite(loss_bf16)
    assert jnp.allclose(loss_bf16, ref_bf16, rtol=5e-2), (loss_bf16, ref_bf16)

    print("KERNEL_OK")
</pallas_src>

<mosaic_0001>
module attributes {stable_mosaic.version = 11 : i64} {
  func.func @_smooth_loss_kernel(%arg0: i32, %arg1: i32, %arg2: memref<1x1x8x16xf32, #tpu.memory_space<vmem>>, %arg3: memref<1x3x8x16xf32, #tpu.memory_space<vmem>>, %arg4: memref<1x1x2xf32, #tpu.memory_space<smem>>, %arg5: memref<1x1x16xf32, #tpu.memory_space<vmem>>, %arg6: memref<3x1x16xf32, #tpu.memory_space<vmem>>) attributes {dimension_semantics = [#tpu.dimension_semantics<parallel>, #tpu.dimension_semantics<arbitrary>], iteration_bounds = array<i64: 2, 2>, scalar_prefetch = 0 : i64, scratch_operands = 2 : i64, tpu.core_type = #tpu.core_type<tc>, window_params = [{transform_indices = @transform_0, window_bounds = array<i64: 1, 1, 8, 16>}, {transform_indices = @transform_1, window_bounds = array<i64: 1, 3, 8, 16>}, {transform_indices = @transform_2, window_bounds = array<i64: 1, 1, 2>}]} {
    %c0 = arith.constant 0 : index
    %c0_0 = arith.constant 0 : index
    %c0_1 = arith.constant 0 : index
    %c0_2 = arith.constant 0 : index
    %0 = vector.load %arg2[%c0, %c0_0, %c0_1, %c0_2] : memref<1x1x8x16xf32, #tpu.memory_space<vmem>>, vector<1x1x8x16xf32>
    %1 = vector.shape_cast %0 : vector<1x1x8x16xf32> to vector<1x8x16xf32>
    %c0_3 = arith.constant 0 : index
    %c0_4 = arith.constant 0 : index
    %c0_5 = arith.constant 0 : index
    %c0_6 = arith.constant 0 : index
    %2 = vector.load %arg3[%c0_3, %c0_4, %c0_5, %c0_6] : memref<1x3x8x16xf32, #tpu.memory_space<vmem>>, vector<1x3x8x16xf32>
    %3 = vector.shape_cast %2 : vector<1x3x8x16xf32> to vector<3x8x16xf32>
    %c0_i32 = arith.constant 0 : i32
    %4 = arith.cmpi eq, %arg1, %c0_i32 : i32
    %5 = arith.extui %4 : i1 to i32
    %c0_i32_7 = arith.constant 0 : i32
    %6 = arith.cmpi ne, %5, %c0_i32_7 : i32
    scf.if %6 {
      %cst_38 = arith.constant 0.000000e+00 : f32
      %c0_39 = arith.constant 0 : index
      %c0_40 = arith.constant 0 : index
      %c0_41 = arith.constant 0 : index
      %62 = memref.load %arg4[%c0_39, %c0_40, %c0_41] : memref<1x1x2xf32, #tpu.memory_space<smem>>
      memref.store %cst_38, %arg4[%c0_39, %c0_40, %c0_41] : memref<1x1x2xf32, #tpu.memory_space<smem>>
      %cst_42 = arith.constant 0.000000e+00 : f32
      %c0_43 = arith.constant 0 : index
      %c0_44 = arith.constant 0 : index
      %c1_45 = arith.constant 1 : index
      %63 = memref.load %arg4[%c0_43, %c0_44, %c1_45] : memref<1x1x2xf32, #tpu.memory_space<smem>>
      memref.store %cst_42, %arg4[%c0_43, %c0_44, %c1_45] : memref<1x1x2xf32, #tpu.memory_space<smem>>
    } else {
    }
    %c0_i32_8 = arith.constant 0 : i32
    %7 = arith.cmpi sgt, %arg1, %c0_i32_8 : i32
    %8 = arith.extui %7 : i1 to i32
    %c0_i32_9 = arith.constant 0 : i32
    %9 = arith.cmpi ne, %8, %c0_i32_9 : i32
    scf.if %9 {
      %c0_38 = arith.constant 0 : index
      %c0_39 = arith.constant 0 : index
      %c0_40 = arith.constant 0 : index
      %62 = vector.load %arg5[%c0_38, %c0_39, %c0_40] : memref<1x1x16xf32, #tpu.memory_space<vmem>>, vector<1x1x16xf32>
      %63 = vector.extract_strided_slice %1 {offsets = [0, 0, 0], sizes = [1, 1, 16], strides = [1, 1, 1]} : vector<1x8x16xf32> to vector<1x1x16xf32>
      %64 = arith.subf %62, %63 : vector<1x1x16xf32>
      %c0_41 = arith.constant 0 : index
      %c0_42 = arith.constant 0 : index
      %c0_43 = arith.constant 0 : index
      %65 = vector.load %arg6[%c0_41, %c0_42, %c0_43] : memref<3x1x16xf32, #tpu.memory_space<vmem>>, vector<3x1x16xf32>
      %66 = vector.extract_strided_slice %3 {offsets = [0, 0, 0], sizes = [3, 1, 16], strides = [1, 1, 1]} : vector<3x8x16xf32> to vector<3x1x16xf32>
      %67 = arith.subf %65, %66 : vector<3x1x16xf32>
      %68 = math.absf %67 : vector<3x1x16xf32>
      %cst_44 = arith.constant dense<0.000000e+00> : vector<1x16xf32>
      %69 = vector.multi_reduction <add>, %68, %cst_44 [0] : vector<3x1x16xf32> to vector<1x16xf32>
      %cst_45 = arith.constant 3.000000e+00 : f32
      %70 = vector.broadcast %cst_45 : f32 to vector<1x16xf32>
      %71 = arith.divf %69, %70 : vector<1x16xf32>
      %cst_46 = arith.constant 0.000000e+00 : f32
      %72 = vector.broadcast %cst_46 : f32 to vector<1x16xf32>
      %73 = arith.subf %72, %71 : vector<1x16xf32>
      %74 = math.exp %73 : vector<1x16xf32>
      %c0_47 = arith.constant 0 : index
      %c0_48 = arith.constant 0 : index
      %c0_49 = arith.constant 0 : index
      %75 = memref.load %arg4[%c0_47, %c0_48, %c0_49] : memref<1x1x2xf32, #tpu.memory_space<smem>>
      %76 = math.absf %64 : vector<1x1x16xf32>
      %cst_50 = arith.constant dense<0.000000e+00> : vector<1x16xf32>
      %77 = vector.multi_reduction <add>, %76, %cst_50 [0] : vector<1x1x16xf32> to vector<1x16xf32>
      %78 = arith.mulf %77, %74 : vector<1x16xf32>
      %cst_51 = arith.constant dense<0.000000e+00> : vector<16xf32>
      %79 = vector.multi_reduction <add>, %78, %cst_51 [0] : vector<1x16xf32> to vector<16xf32>
      %80 = vector.shape_cast %79 : vector<16xf32> to vector<1x16xf32>
      %cst_52 = arith.constant dense<0.000000e+00> : vector<1xf32>
      %81 = vector.multi_reduction <add>, %80, %cst_52 [1] : vector<1x16xf32> to vector<1xf32>
      %82 = vector.shape_cast %81 : vector<1xf32> to vector<1x1xf32>
      %83 = vector.extract %82[0, 0] : f32 from vector<1x1xf32>
      %84 = arith.addf %75, %83 : f32
      %c0_53 = arith.constant 0 : index
      %c0_54 = arith.constant 0 : index
      %c0_55 = arith.constant 0 : index
      %85 = memref.load %arg4[%c0_53, %c0_54, %c0_55] : memref<1x1x2xf32, #tpu.memory_space<smem>>
      memref.store %84, %arg4[%c0_53, %c0_54, %c0_55] : memref<1x1x2xf32, #tpu.memory_space<smem>>
    } else {
    }
    %10 = vector.extract_strided_slice %1 {offsets = [0, 7, 0], sizes = [1, 1, 16], strides = [1, 1, 1]} : vector<1x8x16xf32> to vector<1x1x16xf32>
    %c0_10 = arith.constant 0 : index
    %c0_11 = arith.constant 0 : index
    %c0_12 = arith.constant 0 : index
    %11 = vector.load %arg5[%c0_10, %c0_11, %c0_12] : memref<1x1x16xf32, #tpu.memory_space<vmem>>, vector<1x1x16xf32>
    tpu.vector_store %arg5[%c0_10, %c0_11, %c0_12], %10 {strides = array<i32>} : memref<1x1x16xf32, #tpu.memory_space<vmem>>, vector<1x1x16xf32>,
    %12 = vector.extract_strided_slice %3 {offsets = [0, 7, 0], sizes = [3, 1, 16], strides = [1, 1, 1]} : vector<3x8x16xf32> to vector<3x1x16xf32>
    %c0_13 = arith.constant 0 : index
    %c0_14 = arith.constant 0 : index
    %c0_15 = arith.constant 0 : index
    %13 = vector.load %arg6[%c0_13, %c0_14, %c0_15] : memref<3x1x16xf32, #tpu.memory_space<vmem>>, vector<3x1x16xf32>
    tpu.vector_store %arg6[%c0_13, %c0_14, %c0_15], %12 {strides = array<i32>} : memref<3x1x16xf32, #tpu.memory_space<vmem>>, vector<3x1x16xf32>,
    %c0_16 = arith.constant 0 : index
    %c0_17 = arith.constant 0 : index
    %c0_18 = arith.constant 0 : index
    %14 = memref.load %arg4[%c0_16, %c0_17, %c0_18] : memref<1x1x2xf32, #tpu.memory_space<smem>>
    %15 = vector.extract_strided_slice %1 {offsets = [0, 0, 0], sizes = [1, 7, 16], strides = [1, 1, 1]} : vector<1x8x16xf32> to vector<1x7x16xf32>
    %16 = vector.extract_strided_slice %1 {offsets = [0, 1, 0], sizes = [1, 7, 16], strides = [1, 1, 1]} : vector<1x8x16xf32> to vector<1x7x16xf32>
    %17 = arith.subf %15, %16 : vector<1x7x16xf32>
    %18 = vector.extract_strided_slice %3 {offsets = [0, 0, 0], sizes = [3, 7, 16], strides = [1, 1, 1]} : vector<3x8x16xf32> to vector<3x7x16xf32>
    %19 = vector.extract_strided_slice %3 {offsets = [0, 1, 0], sizes = [3, 7, 16], strides = [1, 1, 1]} : vector<3x8x16xf32> to vector<3x7x16xf32>
    %20 = arith.subf %18, %19 : vector<3x7x16xf32>
    %21 = math.absf %20 : vector<3x7x16xf32>
    %cst = arith.constant dense<0.000000e+00> : vector<7x16xf32>
    %22 = vector.multi_reduction <add>, %21, %cst [0] : vector<3x7x16xf32> to vector<7x16xf32>
    %cst_19 = arith.constant 3.000000e+00 : f32
    %23 = vector.broadcast %cst_19 : f32 to vector<7x16xf32>
    %24 = arith.divf %22, %23 : vector<7x16xf32>
    %cst_20 = arith.constant 0.000000e+00 : f32
    %25 = vector.broadcast %cst_20 : f32 to vector<7x16xf32>
    %26 = arith.subf %25, %24 : vector<7x16xf32>
    %27 = math.exp %26 : vector<7x16xf32>
    %28 = math.absf %17 : vector<1x7x16xf32>
    %cst_21 = arith.constant dense<0.000000e+00> : vector<7x16xf32>
    %29 = vector.multi_reduction <add>, %28, %cst_21 [0] : vector<1x7x16xf32> to vector<7x16xf32>
    %30 = arith.mulf %29, %27 : vector<7x16xf32>
    %cst_22 = arith.constant dense<0.000000e+00> : vector<16xf32>
    %31 = vector.multi_reduction <add>, %30, %cst_22 [0] : vector<7x16xf32> to vector<16xf32>
    %32 = vector.shape_cast %31 : vector<16xf32> to vector<1x16xf32>
    %cst_23 = arith.constant dense<0.000000e+00> : vector<1xf32>
    %33 = vector.multi_reduction <add>, %32, %cst_23 [1] : vector<1x16xf32> to vector<1xf32>
    %34 = vector.shape_cast %33 : vector<1xf32> to vector<1x1xf32>
    %35 = vector.extract %34[0, 0] : f32 from vector<1x1xf32>
    %36 = arith.addf %14, %35 : f32
    %c0_24 = arith.constant 0 : index
    %c0_25 = arith.constant 0 : index
    %c0_26 = arith.constant 0 : index
    %37 = memref.load %arg4[%c0_24, %c0_25, %c0_26] : memref<1x1x2xf32, #tpu.memory_space<smem>>
    memref.store %36, %arg4[%c0_24, %c0_25, %c0_26] : memref<1x1x2xf32, #tpu.memory_space<smem>>
    %c0_27 = arith.constant 0 : index
    %c0_28 = arith.constant 0 : index
    %c1 = arith.constant 1 : index
    %38 = memref.load %arg4[%c0_27, %c0_28, %c1] : memref<1x1x2xf32, #tpu.memory_space<smem>>
    %39 = vector.extract_strided_slice %1 {offsets = [0, 0, 0], sizes = [1, 8, 15], strides = [1, 1, 1]} : vector<1x8x16xf32> to vector<1x8x15xf32>
    %40 = vector.extract_strided_slice %1 {offsets = [0, 0, 1], sizes = [1, 8, 15], strides = [1, 1, 1]} : vector<1x8x16xf32> to vector<1x8x15xf32>
    %41 = arith.subf %39, %40 : vector<1x8x15xf32>
    %42 = vector.extract_strided_slice %3 {offsets = [0, 0, 0], sizes = [3, 8, 15], strides = [1, 1, 1]} : vector<3x8x16xf32> to vector<3x8x15xf32>
    %43 = vector.extract_strided_slice %3 {offsets = [0, 0, 1], sizes = [3, 8, 15], strides = [1, 1, 1]} : vector<3x8x16xf32> to vector<3x8x15xf32>
    %44 = arith.subf %42, %43 : vector<3x8x15xf32>
    %45 = math.absf %44 : vector<3x8x15xf32>
    %cst_29 = arith.constant dense<0.000000e+00> : vector<8x15xf32>
    %46 = vector.multi_reduction <add>, %45, %cst_29 [0] : vector<3x8x15xf32> to vector<8x15xf32>
    %cst_30 = arith.constant 3.000000e+00 : f32
    %47 = vector.broadcast %cst_30 : f32 to vector<8x15xf32>
    %48 = arith.divf %46, %47 : vector<8x15xf32>
    %cst_31 = arith.constant 0.000000e+00 : f32
    %49 = vector.broadcast %cst_31 : f32 to vector<8x15xf32>
    %50 = arith.subf %49, %48 : vector<8x15xf32>
    %51 = math.exp %50 : vector<8x15xf32>
    %52 = math.absf %41 : vector<1x8x15xf32>
    %cst_32 = arith.constant dense<0.000000e+00> : vector<8x15xf32>
    %53 = vector.multi_reduction <add>, %52, %cst_32 [0] : vector<1x8x15xf32> to vector<8x15xf32>
    %54 = arith.mulf %53, %51 : vector<8x15xf32>
    %cst_33 = arith.constant dense<0.000000e+00> : vector<15xf32>
    %55 = vector.multi_reduction <add>, %54, %cst_33 [0] : vector<8x15xf32> to vector<15xf32>
    %56 = vector.shape_cast %55 : vector<15xf32> to vector<1x15xf32>
    %cst_34 = arith.constant dense<0.000000e+00> : vector<1xf32>
    %57 = vector.multi_reduction <add>, %56, %cst_34 [1] : vector<1x15xf32> to vector<1xf32>
    %58 = vector.shape_cast %57 : vector<1xf32> to vector<1x1xf32>
    %59 = vector.extract %58[0, 0] : f32 from vector<1x1xf32>
    %60 = arith.addf %38, %59 : f32
    %c0_35 = arith.constant 0 : index
    %c0_36 = arith.constant 0 : index
    %c1_37 = arith.constant 1 : index
    %61 = memref.load %arg4[%c0_35, %c0_36, %c1_37] : memref<1x1x2xf32, #tpu.memory_space<smem>>
    memref.store %60, %arg4[%c0_35, %c0_36, %c1_37] : memref<1x1x2xf32, #tpu.memory_space<smem>>
    return
  }
  func.func @transform_0(%arg0: i32, %arg1: i32) -> (i32, i32, i32, i32) {
    %c0_i32 = arith.constant 0 : i32
    %c0_i32_0 = arith.constant 0 : i32
    %c0_i32_1 = arith.constant 0 : i32
    return %arg0, %c0_i32, %arg1, %c0_i32_0 : i32, i32, i32, i32
  }
  func.func @transform_1(%arg0: i32, %arg1: i32) -> (i32, i32, i32, i32) {
    %c0_i32 = arith.constant 0 : i32
    %c0_i32_0 = arith.constant 0 : i32
    %c0_i32_1 = arith.constant 0 : i32
    return %arg0, %c0_i32, %arg1, %c0_i32_0 : i32, i32, i32, i32
  }
  func.func @transform_2(%arg0: i32, %arg1: i32) -> (i32, i32, i32) {
    %c0_i32 = arith.constant 0 : i32
    %c0_i32_0 = arith.constant 0 : i32
    %c0_i32_1 = arith.constant 0 : i32
    return %arg0, %c0_i32, %c0_i32_0 : i32, i32, i32
  }
}

</mosaic_0001>

<bundles_post_ra>
// kernel: tpu_custom_call.1
= control target key start
LH: loop header
LB: loop body
LE: loop exit
PB: predicated region body
PF: predicated region fallthrough
CT: control target
= control target key end

     0   :  { %s1156_s0 = inlined_call_operand.hbm [shape: f32[2,1,16,16], index: 0, kind: input, shape index: {}]   ;;  %s1157_s1 = inlined_call_operand.hbm [shape: f32[2,3,16,16], index: 1, kind: input, shape index: {}]   ;;  %s1158_s2 = inlined_call_operand.hbm [shape: f32[2,1,2], index: 2, kind: output, shape index: {}]  }
   0x1   :  { %1164 = sst [smem:[#allocation16_spill]] %s1156_s0 }
   0x2   :  { %7 = vsyncpa [#allocation5], 0 }
   0x3   :  { %9 = vsyncpa [#allocation5 + $0x1], 0 }
   0x4   :  { %10 = vsyncpa [#allocation8], 0 }
   0x5   :  { %12 = vsyncpa [#allocation8 + $0x1], 0 }
   0x6   :  { %13 = vsyncpa [#allocation6], 0 }
   0x7   :  { %15 = vsyncpa [#allocation6 + $0x1], 0  ;;  %s833_s9 = smov 0   ;;  %s835_s10 = smov 0  }
   0x8   :  { %s837_s11 = smov 0   ;;  %s839_s12 = smov 0  }
   0x9   :  { %s841_s13 = smov 0   ;;  %s843_s14 = smov 0  }
   0xa   :  { %s845_s15 = smov 0   ;;  %s847_s16 = smov 0  }
   0xb   :  { %s849_s17 = smov 0   ;;  %s851_s18 = smov 0  }
   0xc   :  { %s853_s19 = smov 0  }
   0xd LB: > { %s490_s20 = sadd.s32 4294967295, %s808_s19   ;;  %s491_s21 = sadd.s32 4294967294, %s808_s19   ;;  %s808_s19 = sphi %s853_s19, %s21_s19   ;;  %s804_s18 = sphi %s851_s18, %s1191_s18   ;;  %s800_s17 = sphi %s849_s17, %s1190_s17   ;;  %s796_s16 = sphi %s847_s16, %s1189_s16   ;;  %s792_s15 = sphi %s845_s15, %s1188_s15   ;;  %s788_s14 = sphi %s843_s14, %s1187_s14   ;;  %s784_s13 = sphi %s841_s13, %s1186_s13   ;;  %s780_s12 = sphi %s839_s12, %s1185_s12   ;;  %s776_s11 = sphi %s837_s11, %s1184_s11   ;;  %s772_s10 = sphi %s835_s10, %s1183_s10   ;;  %s768_s9 = sphi %s833_s9, %s1182_s9  }
   0xe   : > { %s30_s22 = sadd.s32 1, %s800_s17  ;;  %s33_s23 = sadd.s32 1, %s804_s18 }
   0xf   : > { %p31_p0 = scmp.ge.s32.totalorder %s30_s22, 2  ;;  %s42_s24 = sadd.s32 1, %s788_s14 }
  0x10   : > { %p49_p1 = scmp.ne.s32.totalorder %s788_s14, %s784_s13  ;;  %p50_p2 = scmp.eq.s32.totalorder %s808_s19, 0 }
  0x11   : > { %s1193_s22 = smov (%p31_p0, %s30_s22), 0  ;;  %s1195_s23 = smov (!%p31_p0, %s33_s23), %s804_s18 }
  0x12   : > { %1165 = sst [smem:[#allocation13_spill]] %s1193_s22  ;;  %s38_s25 = ssub.s32 %s800_s17, %s1193_s22 }
  0x13   : > { %p899_p3 = por %p50_p2, %p49_p1  ;;  %p35_p4 = scmp.ge.s32.totalorder %s1195_s23, 2 }
  0x14   : > { %p55_p5 = scmp.ne.s32.totalorder %s784_s13, %s780_s12  ;;  %p56_p6 = scmp.eq.s32.totalorder %s490_s20, 0 }
  0x15   : > { %s96_s27 = sadd.s32 1, %s776_s11  ;;  %s1197_s23 = smov (%p35_p4, %s1195_s23), 0 }
  0x16   : > { %1167 = sst [smem:[#allocation14_spill]] %s1197_s23  ;;  %p907_p7 = por %p56_p6, %p55_p5 }
  0x17   : > { %p106_p8 = scmp.ne.s32.totalorder %s776_s11, %s772_s10  ;;  %s37_s29 = ssub.s32 %s804_s18, %s1197_s23 }
  0x18   : > { %s1168_s28 = scalar_select %p907_p7, 1, 0 }
  0x19   : > { %p107_p9 = scmp.eq.s32.totalorder %s490_s20, 3  ;;  %s39_s30 = sor.u32 %s38_s25, %s37_s29 }
  0x1a   : > { %p94_p10 = scmp.eq.s32.totalorder %s37_s29, 0  ;;  %p40_p11 = scmp.eq.s32.totalorder %s39_s30, 0 }
  0x1b   : > { %p915_p12 = por %p107_p9, %p106_p8  ;;  %p112_p13 = scmp.ne.s32.totalorder %s772_s10, %s768_s9 }
  0x1c   : > { %s920_s4 = scalar_select %p94_p10, %s776_s11, %s96_s27  }
  0x1d   : > { %s1169_s3 = scalar_select %p915_p12, 1, 0 }
  0x1e   : > { %s923_s5 = scalar_select %p40_p11, %s788_s14, %s42_s24  }
  0x1f   : > { %p113_p0 = scmp.eq.s32.totalorder %s491_s21, 3  ;;  %p534_p1 = scmp.lt.s32.totalorder %s808_s19, 4 }
  0x20   : > { %1170 = sst [smem:[#allocation15_spill]] %s923_s5  ;;  %s933_s7 = sand.u32 1, %s788_s14  }
  0x21   : > { %p928_p2 = por %p113_p0, %p112_p13  ;;  %s494_s8 = sshll.u32 %s933_s7, 3 }
  0x22   : > { %s495_s12 = sshll.u32 %s804_s18, 1  ;;  %s137_s25 = scalar_lea.vmem [#allocation4], %s494_s8 }
  0x23   : > { %s1171_s6 = scalar_select %p928_p2, 1, 0 }
  0x24   : > { %s142_s20 = sadd.s32 %s800_s17, %s495_s12  ;;  %s146_s27 = sshll.u32 %s137_s25, 4  ;;  %s938_s27 = int_to_ptr.vmem [resolvable:$true] %s146_s27 }
  0x25   : > { %s496_s24 = sshll.u32 %s142_s20, 7  ;;  %s1172_s0 = sld [smem:[#allocation16_spill]] }
  0x26   : > { %p947_p4 = pnand %p534_p1, %p899_p3  ;;  %s510_s12 = smul.u32 6, %s804_s18 }
  0x27   : > { %s134_s20 = scalar_lea.sflag [#allocation5], %s933_s7 }
  0x28   : > { %p638_p6 = pneg %p947_p4 }
  0x2b   : > { %s943_s30 = scalar_lea.hbm %s1172_s0, %s496_s24  ;;  %s641_s29 = scalar_lea.hbm %s1172_s0, 512 }
  0x2c   : > { %s636_s25 = scalar_lea.hbm %s943_s30, 128  ;;  %p642_p3 = scmp.lt.u32.totalorder %s943_s30, %s1172_s0 }
  0x2d   : > { %p637_p5 = scmp.ne.s32.totalorder %s943_s30, %s636_s25  ;;  %p643_p10 = scmp.lt.u32.totalorder %s641_s29, %s636_s25 }
  0x2e   : > { %p645_p13 = scmp.lt.u32.totalorder %s636_s25, %s943_s30 }
  0x2f   : > { %p639_p8 = pnand %p638_p6, %p637_p5  ;;  %p644_p11 = por %p643_p10, %p642_p3 }
  0x31   : > { %p640_p9 = pneg %p639_p8  ;;  %p646_p0 = por %p645_p13, %p644_p11 }
  0x33   : > { %p647_p1 = pnand %p646_p0, %p640_p9 }
  0x35   : > { %650 = shalt.err (!%p647_p1)
}
  0x36   : > { %s651_s8 = scalar_lea.vmem %s938_s27, 128  ;;  %s810_s26 = smov [#allocation4]  }
  0x37   : > { %p652_p5 = scmp.ne.s32.totalorder %s938_s27, %s651_s8  ;;  %s656_s24 = sshll.u32 %s810_s26, 4  ;;  %s657_s24 = int_to_ptr.vmem [resolvable:$false] %s656_s24 }
  0x38   : > { %s658_s22 = scalar_lea.vmem %s657_s24, 256  ;;  %p659_p12 = scmp.lt.s32.totalorder %s938_s27, %s657_s24 }
  0x39   : > { %p654_p8 = pnand %p652_p5, %p638_p6  ;;  %p660_p3 = scmp.lt.s32.totalorder %s658_s22, %s651_s8 }
  0x3b   : > { %p655_p2 = pneg %p654_p8  ;;  %p661_p10 = por %p660_p3, %p659_p12 }
  0x3d   : > { %p662_p11 = pnand %p661_p10, %p655_p2 }
  0x3f   : > { %665 = shalt.err (!%p662_p11)
}
  0x40   : > { %530 = dma.hbm_to_vmem [thread:$0]  (!%p947_p4), %s943_s30, 128, %s938_s27, %s134_s20  }
  0x41   : > { %s162_s25 = sadd.s32 %s800_s17, %s510_s12  ;;  %p498_p9 = scmp.ge.s32.totalorder %s808_s19, 1 }
  0x42   : > { %p173_p13 = scmp.lt.s32.totalorder %s808_s19, 5  ;;  %s497_s8 = sshll.u32 %s162_s25, 7 }
  0x43   : > { %s1174_s29 = smul.u32 24, %s933_s7  ;;  %s993_s5 = scalar_lea.hbm %s1157_s1, %s497_s8 }
  0x44   : > { %p986_p12 = pnand %p498_p9, %p173_p13  ;;  %s154_s27 = scalar_lea.sflag [#allocation8], %s933_s7 }
  0x45   : > { %s157_s21 = scalar_lea.vmem [#allocation7], %s1174_s29  ;;  %s666_s30 = scalar_lea.hbm %s993_s5, 384 }
  0x46   : > { %s165_s26 = sshll.u32 %s157_s21, 4  ;;  %p667_p2 = scmp.ne.s32.totalorder %s993_s5, %s666_s30  ;;  %s995_s26 = int_to_ptr.vmem [resolvable:$true] %s165_s26 }
  0x47   : > { %s671_s25 = scalar_lea.hbm %s1157_s1, 1536  ;;  %p672_p5 = scmp.lt.u32.totalorder %s993_s5, %s1157_s1 }
  0x48   : > { %p669_p0 = pnand %p667_p2, %p638_p6  ;;  %p673_p8 = scmp.lt.u32.totalorder %s671_s25, %s666_s30 }
  0x49   : > { %p675_p10 = scmp.lt.u32.totalorder %s666_s30, %s993_s5 }
  0x4a   : > { %p670_p1 = pneg %p669_p0  ;;  %p674_p3 = por %p673_p8, %p672_p5 }
  0x4c   : > { %p676_p11 = por %p675_p10, %p674_p3 }
  0x4e   : > { %p677_p9 = pnand %p676_p11, %p670_p1 }
  0x50   : > { %680 = shalt.err (!%p677_p9)
}
  0x51   : > { %s681_s29 = scalar_lea.vmem %s995_s26, 384  ;;  %s811_s21 = smov [#allocation7]  }
  0x52   : > { %p682_p13 = scmp.ne.s32.totalorder %s995_s26, %s681_s29  ;;  %s686_s22 = sshll.u32 %s811_s21, 4  ;;  %s687_s22 = int_to_ptr.vmem [resolvable:$false] %s686_s22 }
  0x53   : > { %s688_s12 = scalar_lea.vmem %s687_s22, 768  ;;  %p689_p7 = scmp.lt.s32.totalorder %s995_s26, %s687_s22 }
  0x54   : > { %p684_p2 = pnand %p682_p13, %p638_p6  ;;  %p690_p5 = scmp.lt.s32.totalorder %s688_s12, %s681_s29 }
  0x56   : > { %p685_p0 = pneg %p684_p2  ;;  %p691_p8 = por %p690_p5, %p689_p7 }
  0x58   : > { %p692_p3 = pnand %p691_p8, %p685_p0 }
  0x5a   : > { %695 = shalt.err (!%p692_p3)
}
  0x5b   : > { %s812_s30 = smov 256   ;;  %s813_s20 = smov 128  }
  0x5c   : > { %s814_s25 = smov 8   ;;  %177 = sbr.rel (%p986_p12) target bundleno = 692 (0x2b4), region = 28 }
  0x5d   : > { %533 = dma.hbm_to_vmem [thread:$0]  (!%p947_p4), %s993_s5, 384, %s995_s26, %s154_s27, %s812_s30, %s813_s20, %s814_s25  }
  0x5e   : > { %s179_s0 = sand.u32 (!%p986_p12), 1, %s784_s13   ;;  %p1176_p7 = scmp.ne.s32.totalorder (!%p986_p12), %s1168_s28, 0 }
  0x5f   : > { %s499_s8 = sshll.u32 (!%p986_p12), %s179_s0, 3  ;;  %s180_s29 = scalar_lea.sflag (!%p986_p12), [#allocation5], %s179_s0 }
  0x60   : > { %s183_s21 = scalar_lea.vmem (!%p986_p12), [#allocation4], %s499_s8 }
  0x63   : > { %755 = dma.done.wait (%p1176_p7), %s180_s29, 128  }
  0x64   : > { %757 = vsyncadd (%p1176_p7), %s180_s29, 4294967168  ;;  %s511_s22 = smul.u32 24, %s179_s0  ;;  %s189_s12 = scalar_lea.sflag [#allocation8], %s179_s0 }
  0x66   : > { %s192_s23 = scalar_lea.vmem [#allocation7], %s511_s22 }
  0x67   : > { %759 = dma.done.wait (%p1176_p7), %s189_s12, 384  }
  0x68   : > { %761 = vsyncadd (%p1176_p7), %s189_s12, 4294966912  ;;  %s215_s5 = sand.u32 1, %s772_s10   ;;  %p535_p4 = scmp.eq.s32.totalorder %s792_s15, 0  ;;  %v1047_v0 = vld [vmem:[%s183_s21] sm:$0xff]  ;;  %v1051_v2 = vld [vmem:[%s192_s23 + $0x8] sm:$0xff] }
  0x69   : > { %s1038_s7 = sshll.u32 %s215_s5, 7  ;;  %s815_s24 = smov 0.0   ;;  %v1049_v1 = vld [vmem:[%s192_s23] sm:$0xff]  ;;  %v1053_v3 = vld [vmem:[%s192_s23 + $0x10] sm:$0xff] }
  0x6a   : > { %s1041_s26 = scalar_lea.smem [#allocation9], %s1038_s7  ;;  %p502_p6 = scmp.le.s32.totalorder %s792_s15, 0 }
  0x6b   : > { %523 = sst [smem:[%s1041_s26]] (%p535_p4), %s815_s24  ;;  %s228_s27 = scalar_lea.smem %s1041_s26, 1 [#allocation9]  ;;  %v236_v4 = vld [vmem:[#allocation3] sm:$0x1] (!%p502_p6)  ;;  %v237_v5 = vld [vmem:[#allocation3 + $0x1] sm:$0x1] (!%p502_p6)  ;;  %vm245_vm0 = vcmask (!%p502_p6), 122880  }
  0x6c   : > { %524 = sst [smem:[%s228_s27]] (%p535_p4), %s815_s24  ;;  %233 = sbr.rel (%p502_p6) target bundleno = 333 (0x14d), region = 44 }
  0x6d   : > { %v238_v6 = vld [vmem:[#allocation3 + $0x2] sm:$0x1] (!%p502_p6)  ;;  %v239_v7 = vsub.f32 (!%p502_p6), %v236_v4, %v1049_v1  ;;  %v240_v8 = vsub.f32 (!%p502_p6), %v237_v5, %v1051_v2  ;;  %v234_v21 = vld [vmem:[#allocation2] sm:$0x1] (!%p502_p6)  ;;  %s503_s15 = sld [smem:[#allocation9 + %s1038_s7]] (!%p502_p6) }
  0x6e   : > { %v241_v9 = vsub.f32 (!%p502_p6), %v238_v6, %v1053_v3  ;;  %v235_v22 = vsub.f32 (!%p502_p6), %v234_v21, %v1047_v0 }
  0x6f   : > { %v242_v10 = vand.u32 (!%p502_p6), 2147483647, %v239_v7  ;;  %v243_v11 = vand.u32 (!%p502_p6), 2147483647, %v240_v8 }
  0x70   : > { %v244_v12 = vand.u32 (!%p502_p6), 2147483647, %v241_v9  ;;  %v257_v23 = vand.u32 (!%p502_p6), 2147483647, %v235_v22 }
  0x71   : > { %v246_v13 = vsel (!%p502_p6), %vm245_vm0, %v242_v10, 0.0  ;;  %v247_v14 = vsel (!%p502_p6), %vm245_vm0, %v243_v11, 0.0 }
  0x72   : > { %v248_v15 = vadd.f32 (!%p502_p6), %v247_v14, %v246_v13  ;;  %v249_v16 = vsel (!%p502_p6), %vm245_vm0, %v244_v12, 0.0 }
  0x74   : > { %v250_v17 = vadd.f32 %v249_v16, %v248_v15 }
  0x76   : > { %v252_v18 = vmul.f32 0.33333334, %v250_v17 }
  0x78   : > { %v253_v19 = vsub.f32 0.0, %v252_v18 }
  0x7a   : > { %v254_v20 = vmul.f32 1.442695, %v253_v19 }
  0x7c   : > { %630 = vpow2.f32 %v254_v20 }
  0x86   : > { %v631_v24 = vpop.eup %630 }
  0x87   : > { %v259_v25 = vmul.f32 %v631_v24, %v257_v23 }
  0x89   : > { %v261_v26 = vsel %vm245_vm0, %v259_v25, 0.0 }
  0x8a   : > { %262 = vadd.xlane.f32.xlu0 %v261_v26 }
 0x117   : > { %v263_v27 = vpop.xlane.xlu0 %262 }
 0x118   : > { %512 = vpush %v263_v27 }
 0x149   : > { %s513_s28 = spop %512 }
 0x14a   : > { %s265_s30 = sadd.f32 %s513_s28, %s503_s15 }
 0x14c   : > { %267 = sst [smem:[%s1041_s26]] %s265_s30 }
 0x14d PF: > { %v281_v28 = vrot.slane %v1049_v1, 1  ;;  %v282_v29 = vrot.slane %v1051_v2, 1  ;;  %v283_v30 = vrot.slane %v1053_v3, 1  ;;  %s816_s20 = smov 127   ;;  %vm293_vm1 = vcmask 129024   ;;  %s504_s25 = sld [smem:[#allocation9 + %s1038_s7]] }
 0x14e   : > { %327 = vrot.lane.b32.xlu0 %v1049_v1, %s816_s20  ;;  %331 = vrot.lane.b32.xlu1 %v1053_v3, %s816_s20  ;;  %v275_v45 = vrot.slane %v1047_v0, 1  ;;  %vm314_vm2 = vcmask 130048   ;;  %vm268_vm3 = vcmask 130055   ;;  %vm342_vm4 = vcmask 121856   ;;  %s817_s29 = smov 1   ;;  %s506_s22 = sshll.u32 %s796_s16, 4 }
 0x14f   : > { %v287_v31 = vsub.f32 %v1049_v1, %v281_v28  ;;  %v288_v32 = vsub.f32 %v1051_v2, %v282_v29  ;;  %v289_v33 = vsub.f32 %v1053_v3, %v283_v30  ;;  %269 = vst.msk [vmem:[#allocation2 - $0x7] sm:$0x80] %vm268_vm3, %v1047_v0  ;;  %270 = vst.msk [vmem:[#allocation3 - $0x7] sm:$0x80] %vm268_vm3, %v1049_v1  ;;  %s381_s28 = scalar_lea.hbm %s1158_s2, %s506_s22  ;;  %s370_s30 = scalar_lea.sflag [#allocation6], %s215_s5 }
 0x150   : > { %v277_v46 = vsub.f32 %v1047_v0, %v275_v45  ;;  %271 = vst.msk [vmem:[#allocation3 - $0x6] sm:$0x80] %vm268_vm3, %v1051_v2  ;;  %272 = vst.msk [vmem:[#allocation3 - $0x5] sm:$0x80] %vm268_vm3, %v1053_v3  ;;  %s696_s7 = scalar_lea.hbm %s381_s28, 16  ;;  %p1177_p1 = scmp.ne.s32.totalorder %s1169_s3, 0 }
 0x151   : > { %v290_v34 = vand.u32 2147483647, %v287_v31  ;;  %v291_v35 = vand.u32 2147483647, %v288_v32  ;;  %v292_v36 = vand.u32 2147483647, %v289_v33  ;;  %p697_p12 = scmp.ne.s32.totalorder %s381_s28, %s696_s7  ;;  %p701_p9 = scmp.lt.u32.totalorder %s381_s28, %s1158_s2 }
 0x152   : > { %329 = vrot.lane.b32.xlu0 %v1051_v2, %s816_s20  ;;  %323 = vrot.lane.b32.xlu1 %v1047_v0, %s816_s20  ;;  %v304_v47 = vand.u32 2147483647, %v277_v46  ;;  %p704_p0 = scmp.lt.u32.totalorder %s696_s7, %s381_s28 }
 0x153   : > { %v294_v37 = vsel %vm293_vm1, %v290_v34, 0.0  ;;  %v295_v38 = vsel %vm293_vm1, %v291_v35, 0.0  ;;  %v297_v39 = vsel %vm293_vm1, %v292_v36, 0.0  ;;  %p698_p10 = pnand %p697_p12, %p1177_p1 }
 0x154   : > { %v296_v40 = vadd.f32 %v295_v38, %v294_v37 }
 0x155   : > { %p699_p11 = pneg %p698_p10 }
 0x156   : > { %v298_v41 = vadd.f32 %v297_v39, %v296_v40 }
 0x158   : > { %v300_v42 = vmul.f32 0.33333334, %v298_v41 }
 0x15a   : > { %v301_v43 = vsub.f32 0.0, %v300_v42 }
 0x15c   : > { %v302_v44 = vmul.f32 1.442695, %v301_v43 }
 0x15e   : > { %632 = vpow2.f32 %v302_v44 }
 0x168   : > { %v633_v48 = vpop.eup %632 }
 0x169   : > { %v306_v49 = vmul.f32 %v633_v48, %v304_v47 }
 0x16b   : > { %v307_v50 = vsel %vm293_vm1, %v306_v49, 0.0 }
 0x16c   : > { %v308_v51 = vrot.slane %v307_v50, 4 }
 0x16e   : > { %v309_v52 = vadd.f32 %v308_v51, %v307_v50 }
 0x170   : > { %v310_v53 = vrot.slane %v309_v52, 2 }
 0x172   : > { %v311_v54 = vadd.f32 %v310_v53, %v309_v52 }
 0x174   : > { %v312_v55 = vrot.slane %v311_v54, 1 }
 0x176   : > { %v313_v56 = vadd.f32 %v312_v55, %v311_v54 }
 0x178   : > { %v315_v57 = vsel %vm314_vm2, %v313_v56, 0.0 }
 0x179   : > { %316 = vadd.xlane.f32.xlu0 %v315_v57 }
 0x1c0   : > { %v328_v58 = vpop.permute.xlu0 %327  ;;  %v332_v59 = vpop.permute.xlu1 %331 }
 0x1c1   : > { %v336_v60 = vsub.f32 %v1049_v1, %v328_v58  ;;  %v338_v61 = vsub.f32 %v1053_v3, %v332_v59 }
 0x1c3   : > { %v339_v63 = vand.u32 2147483647, %v336_v60  ;;  %v341_v5 = vand.u32 2147483647, %v338_v61 }
 0x1c4   : > { %v330_v62 = vpop.permute.xlu0 %329  ;;  %v324_v3 = vpop.permute.xlu1 %323 }
 0x1c5   : > { %v337_v4 = vsub.f32 %v1051_v2, %v330_v62  ;;  %v343_v7 = vsel %vm342_vm4, %v339_v63, 0.0  ;;  %v346_v9 = vsel %vm342_vm4, %v341_v5, 0.0  ;;  %v326_v14 = vsub.f32 %v1047_v0, %v324_v3 }
 0x1c7   : > { %v340_v6 = vand.u32 2147483647, %v337_v4  ;;  %v352_v2 = vand.u32 2147483647, %v326_v14 }
 0x1c9   : > { %v344_v8 = vsel %vm342_vm4, %v340_v6, 0.0 }
 0x1ca   : > { %v345_v10 = vadd.f32 %v344_v8, %v343_v7 }
 0x1cc   : > { %v347_v11 = vadd.f32 %v346_v9, %v345_v10 }
 0x1ce   : > { %v348_v12 = vmul.f32 0.33333334, %v347_v11 }
 0x1d0   : > { %v349_v13 = vsub.f32 0.0, %v348_v12 }
 0x1d2   : > { %v350_v1 = vmul.f32 1.442695, %v349_v13 }
 0x1d4   : > { %634 = vpow2.f32 %v350_v1 }
 0x1de   : > { %v635_v15 = vpop.eup %634 }
 0x1df   : > { %v354_v16 = vmul.f32 %v635_v15, %v352_v2 }
 0x1e1   : > { %v355_v17 = vsel %vm342_vm4, %v354_v16, 0.0 }
 0x1e2   : > { %v356_v18 = vrot.slane %v355_v17, 4 }
 0x1e4   : > { %v357_v19 = vadd.f32 %v356_v18, %v355_v17 }
 0x1e6   : > { %v358_v20 = vrot.slane %v357_v19, 2 }
 0x1e8   : > { %v359_v21 = vadd.f32 %v358_v20, %v357_v19 }
 0x1ea   : > { %v360_v22 = vrot.slane %v359_v21, 1 }
 0x1ec   : > { %v361_v23 = vadd.f32 %v360_v22, %v359_v21 }
 0x1ee   : > { %v362_v24 = vsel %vm342_vm4, %v361_v23, 0.0 }
 0x1ef   : > { %363 = vadd.xlane.f32.xlu1 %v362_v24 }
 0x206   : > { %v317_v0 = vpop.xlane.xlu0 %316 }
 0x207   : > { %514 = vpush %v317_v0 }
 0x238   : > { %s515_s0 = spop %514 }
 0x239   : > { %s319_s8 = sadd.f32 %s515_s0, %s504_s25  ;;  %s700_s0 = scalar_lea.hbm %s1158_s2, 32 }
 0x23a   : > { %p702_p13 = scmp.lt.u32.totalorder %s700_s0, %s696_s7 }
 0x23b   : > { %321 = sst [smem:[%s1041_s26]] %s319_s8 }
 0x23c   : > { %s322_s21 = sld [smem:[%s1041_s26 + %s817_s29]]  ;;  %p703_p2 = por %p702_p13, %p701_p9 }
 0x23e   : > { %p705_p5 = por %p704_p0, %p703_p2 }
 0x240   : > { %p706_p8 = pnand %p705_p5, %p699_p11 }
 0x27c   : > { %v364_v25 = vpop.xlane.xlu1 %363 }
 0x27d   : > { %516 = vpush %v364_v25 }
 0x2ae   : > { %s517_s12 = spop %516 }
 0x2af   : > { %s366_s23 = sadd.f32 %s517_s12, %s322_s21 }
 0x2b1   : > { %368 = sst [smem:[%s228_s27]] %s366_s23 }
 0x2b2   : > { %709 = shalt.err (!%p706_p8)
}
 0x2b3   : > { %525 = dma.smem_to_hbm (%p1177_p1), %s1041_s26, 16, %s381_s28, %s370_s30  }
 0x2b4 PF: > { %p508_p3 = scmp.lt.s32.totalorder %s808_s19, 2 }
 0x2b5   : > { %s393_s5 = sand.u32 (!%p508_p3), 1, %s768_s9   ;;  %p1178_p7 = scmp.ne.s32.totalorder (!%p508_p3), %s1171_s6, 0 }
 0x2b6   : > { %388 = sbr.rel (%p508_p3) target bundleno = 704 (0x2c0), region = 52  ;;  %s394_s27 = scalar_lea.sflag (!%p508_p3), [#allocation6], %s393_s5 }
 0x2bd   : > { %763 = dma.done.wait (%p1178_p7), %s394_s27, 16  }
 0x2be   : > { %765 = vsyncadd (%p1178_p7), %s394_s27, 4294967280 }
 0x2bf   : > { %399 = sfence }
 0x2c0 PF: > { %s21_s19 = sadd.s32 1, %s808_s19   ;;  %s1179_s3 = sld [smem:[#allocation15_spill]] }
 0x2c1   : > { %p18_p4 = scmp.ge.s32.totalorder %s21_s19, 6   ;;  %s1180_s26 = sld [smem:[#allocation13_spill]] }
 0x2c2   : > { %s1181_s29 = sld [smem:[#allocation14_spill]]  ;;  %s1182_s9 = smov %s772_s10 }
 0x2c3   : > { %s1183_s10 = smov %s776_s11  ;;  %s1184_s11 = smov %s920_s4 }
 0x2c4   : > { %s1185_s12 = smov %s784_s13  ;;  %s1186_s13 = smov %s788_s14 }
 0x2c5   : > { %s1188_s15 = smov %s800_s17  ;;  %s1189_s16 = smov %s804_s18 }
 0x2c6   : > { %s1187_s14 = smov %s1179_s3  ;;  %20 = sbr.rel (!%p18_p4) target bundleno = 13 (0xd), region = 99 }
 0x2c7   : > { %s1190_s17 = smov %s1180_s26 }
 0x2c8   : > { %s1191_s18 = smov %s1181_s29 }
 0x2cd   :  { %400 = vsyncpa [#allocation5], 1 }
 0x2ce   :  { %402 = vsyncpa [#allocation5 + $0x1], 1 }
 0x2cf   :  { %403 = vsyncpa [#allocation8], 1 }
 0x2d0   :  { %405 = vsyncpa [#allocation8 + $0x1], 1 }
 0x2d1   :  { %406 = vsyncpa [#allocation6], 1 }
 0x2d2   :  { %408 = vsyncpa [#allocation6 + $0x1], 1 }

</bundles_post_ra>
